<compile_context>
chip_gen: v7x
topology: tpu7x:2x2x1
jax: 0.10.0
libtpu: 0.0.40
codegen_flags: <defaults>
</compile_context>

<pallas_src>
import jax
import jax.numpy as jnp
from jax.experimental import pallas as pl
from jax.experimental.pallas import tpu as pltpu


def _make_kernel(hb, in_dim, out_dim):
    """Kernel over one (batch-tile x head-block) tile."""

    def kernel(x_ref, w_ref, b_ref, o_ref):
        # x_ref: (Bt, hb*in_dim)   w_ref: (hb, in_dim, out_dim)
        # b_ref: (1, hb*out_dim)   o_ref: (Bt, hb*out_dim)
        for hh in range(hb):  # static unrolled loop over heads in this block
            xh = x_ref[:, hh * in_dim:(hh + 1) * in_dim]          # (Bt, in_dim)
            wh = w_ref[hh]                                        # (in_dim, out_dim)
            yh = jnp.dot(xh, wh, preferred_element_type=jnp.float32)
            yh = yh + b_ref[:, hh * out_dim:(hh + 1) * out_dim].astype(jnp.float32)
            o_ref[:, hh * out_dim:(hh + 1) * out_dim] = yh.astype(o_ref.dtype)

    return kernel


def _pick_batch_tile(B, max_tile=256):
    if B <= max_tile:
        return B
    t = max_tile - (max_tile % 8)
    while t >= 8:
        if B % t == 0:
            return t
        t -= 8
    return B


def _pick_head_block(H, in_dim, out_dim, bt, itemsize, budget_bytes):
    if in_dim % 128 != 0 or out_dim % 128 != 0:
        # x/out block lane dims must then equal the full feature axis, i.e. all
        # heads live in one block.
        return H
    best = 1
    for hb in range(1, H + 1):
        if H % hb:
            continue
        elems = (bt * hb * in_dim            # x block
                 + hb * in_dim * out_dim     # weight block
                 + bt * hb * out_dim         # out block
                 + hb * out_dim)             # bias block
        if 2 * elems * itemsize <= budget_bytes:  # double-buffered
            best = hb
    return best


def sparse_linear(x, weight, bias, *, vmem_budget_bytes=24 * 1024 * 1024):
    """x: (B, full_in), weight: (H, in_dim, out_dim), bias: (full_out,)."""
    B, full_in = x.shape
    H, in_dim, out_dim = weight.shape
    assert full_in == H * in_dim
    full_out = H * out_dim
    assert bias.shape == (full_out,)

    bt = _pick_batch_tile(B)
    hb = _pick_head_block(H, in_dim, out_dim, bt,
                          jnp.dtype(x.dtype).itemsize, vmem_budget_bytes)
    gh, gb = H // hb, B // bt

    bias2d = bias.reshape(1, full_out)
    kernel = _make_kernel(hb, in_dim, out_dim)

    return pl.pallas_call(
        kernel,
        out_shape=jax.ShapeDtypeStruct((B, full_out), x.dtype),
        grid_spec=pltpu.PrefetchScalarGridSpec(
            num_scalar_prefetch=0,
            # batch tiles innermost: the weight block index repeats across them,
            # so W stays resident in VMEM (no re-DMA per batch tile).
            grid=(gh, gb),
            in_specs=[
                pl.BlockSpec((bt, hb * in_dim), lambda h, b: (b, h)),
                pl.BlockSpec((hb, in_dim, out_dim), lambda h, b: (h, 0, 0)),
                pl.BlockSpec((1, hb * out_dim), lambda h, b: (0, h)),
            ],
            out_specs=pl.BlockSpec((bt, hb * out_dim), lambda h, b: (b, h)),
        ),
        compiler_params=pltpu.CompilerParams(
            dimension_semantics=("parallel", "parallel")),
    )(x, weight, bias2d)


def sparse_linear_ref(x, weight, bias):
    B = x.shape[0]
    H, in_dim, out_dim = weight.shape
    xh = x.reshape(B, H, in_dim)
    y = jnp.einsum('bhd,hdl->bhl', xh, weight)
    return y.reshape(B, H * out_dim) + bias


def init_params(key, heads, in_dim, out_dim):
    # xavier_uniform_ with gain = calculate_gain('relu') = sqrt(2), per-head.
    gain = 2.0 ** 0.5
    bound = gain * (6.0 / (in_dim + out_dim)) ** 0.5
    weight = jax.random.uniform(key, (heads, in_dim, out_dim), dtype=jnp.float32,
                                minval=-bound, maxval=bound)
    bias = jnp.zeros((heads * out_dim,), dtype=jnp.float32)
    return weight, bias


if __name__ == "__main__":
    # Config 1: module defaults (full_in=full_out=1024, heads=8 -> 128x128 heads).
    # Exercises the 128-aligned lane-dense fast path with a multi-head block.
    B, H, in_dim, out_dim = 16, 8, 128, 128
    k1, k2, k3 = jax.random.split(jax.random.PRNGKey(0), 3)
    x = jax.random.normal(k1, (B, H * in_dim), dtype=jnp.float32)
    weight, bias = init_params(k2, H, in_dim, out_dim)
    bias = bias + 0.1 * jax.random.normal(k3, bias.shape, dtype=jnp.float32)

    out = jax.block_until_ready(sparse_linear(x, weight, bias))
    ref = sparse_linear_ref(x, weight, bias)
    assert out.shape == (B, H * out_dim)
    assert jnp.allclose(out, ref, atol=1e-2, rtol=1e-2)

    # Config 2: small non-128 head dims (heads=4, in=out=32) -> single-block
    # fallback path where blocks span the full feature axes.
    B2, H2, in2, out2 = 8, 4, 32, 32
    j1, j2, j3 = jax.random.split(jax.random.PRNGKey(1), 3)
    x2 = jax.random.normal(j1, (B2, H2 * in2), dtype=jnp.float32)
    w2, b2 = init_params(j2, H2, in2, out2)
    b2 = b2 + 0.1 * jax.random.normal(j3, b2.shape, dtype=jnp.float32)

    out2 = jax.block_until_ready(sparse_linear(x2, w2, b2))
    ref2 = sparse_linear_ref(x2, w2, b2)
    assert out2.shape == (B2, H2 * out2.shape[1] // H2)
    assert jnp.allclose(out2, ref2, atol=1e-2, rtol=1e-2)

    print("KERNEL_OK")
</pallas_src>

<mosaic_0001>
module attributes {stable_mosaic.version = 11 : i64} {
  func.func @kernel(%arg0: i32, %arg1: i32, %arg2: memref<16x1024xf32, #tpu.memory_space<vmem>>, %arg3: memref<8x128x128xf32, #tpu.memory_space<vmem>>, %arg4: memref<1x1024xf32, #tpu.memory_space<vmem>>, %arg5: memref<16x1024xf32, #tpu.memory_space<vmem>>) attributes {dimension_semantics = [#tpu.dimension_semantics<parallel>, #tpu.dimension_semantics<parallel>], iteration_bounds = array<i64: 1, 1>, scalar_prefetch = 0 : i64, scratch_operands = 0 : i64, tpu.core_type = #tpu.core_type<tc>, window_params = [{transform_indices = @transform_0, window_bounds = array<i64: 16, 1024>}, {transform_indices = @transform_1, window_bounds = array<i64: 8, 128, 128>}, {transform_indices = @transform_2, window_bounds = array<i64: 1, 1024>}, {transform_indices = @transform_3, window_bounds = array<i64: 16, 1024>}]} {
    %c0 = arith.constant 0 : index
    %c0_0 = arith.constant 0 : index
    %0 = vector.load %arg2[%c0, %c0_0] : memref<16x1024xf32, #tpu.memory_space<vmem>>, vector<16x128xf32>
    %c0_1 = arith.constant 0 : index
    %c0_2 = arith.constant 0 : index
    %c0_3 = arith.constant 0 : index
    %1 = vector.load %arg3[%c0_1, %c0_2, %c0_3] : memref<8x128x128xf32, #tpu.memory_space<vmem>>, vector<1x128x128xf32>
    %2 = vector.shape_cast %1 : vector<1x128x128xf32> to vector<128x128xf32>
    %cst = arith.constant dense<0.000000e+00> : vector<16x128xf32>
    %3 = tpu.matmul %0, %2, %cst {dimension_numbers = #tpu.dot_dimension_numbers<[1], [0], [0], [1], [0, 0, 1, 1], [], []>} : vector<16x128xf32>, vector<128x128xf32>, vector<16x128xf32> -> vector<16x128xf32>
    %c0_4 = arith.constant 0 : index
    %c0_5 = arith.constant 0 : index
    %4 = vector.load %arg4[%c0_4, %c0_5] : memref<1x1024xf32, #tpu.memory_space<vmem>>, vector<1x128xf32>
    %5 = vector.broadcast %4 : vector<1x128xf32> to vector<16x128xf32>
    %6 = arith.addf %3, %5 : vector<16x128xf32>
    %c0_6 = arith.constant 0 : index
    %c0_7 = arith.constant 0 : index
    %7 = vector.load %arg5[%c0_6, %c0_7] : memref<16x1024xf32, #tpu.memory_space<vmem>>, vector<16x128xf32>
    tpu.vector_store %arg5[%c0_6, %c0_7], %6 {strides = array<i32>} : memref<16x1024xf32, #tpu.memory_space<vmem>>, vector<16x128xf32>,
    %c0_8 = arith.constant 0 : index
    %c128 = arith.constant 128 : index
    %8 = vector.load %arg2[%c0_8, %c128] : memref<16x1024xf32, #tpu.memory_space<vmem>>, vector<16x128xf32>
    %c1 = arith.constant 1 : index
    %c0_9 = arith.constant 0 : index
    %c0_10 = arith.constant 0 : index
    %9 = vector.load %arg3[%c1, %c0_9, %c0_10] : memref<8x128x128xf32, #tpu.memory_space<vmem>>, vector<1x128x128xf32>
    %10 = vector.shape_cast %9 : vector<1x128x128xf32> to vector<128x128xf32>
    %cst_11 = arith.constant dense<0.000000e+00> : vector<16x128xf32>
    %11 = tpu.matmul %8, %10, %cst_11 {dimension_numbers = #tpu.dot_dimension_numbers<[1], [0], [0], [1], [0, 0, 1, 1], [], []>} : vector<16x128xf32>, vector<128x128xf32>, vector<16x128xf32> -> vector<16x128xf32>
    %c0_12 = arith.constant 0 : index
    %c128_13 = arith.constant 128 : index
    %12 = vector.load %arg4[%c0_12, %c128_13] : memref<1x1024xf32, #tpu.memory_space<vmem>>, vector<1x128xf32>
    %13 = vector.broadcast %12 : vector<1x128xf32> to vector<16x128xf32>
    %14 = arith.addf %11, %13 : vector<16x128xf32>
    %c0_14 = arith.constant 0 : index
    %c128_15 = arith.constant 128 : index
    %15 = vector.load %arg5[%c0_14, %c128_15] : memref<16x1024xf32, #tpu.memory_space<vmem>>, vector<16x128xf32>
    tpu.vector_store %arg5[%c0_14, %c128_15], %14 {strides = array<i32>} : memref<16x1024xf32, #tpu.memory_space<vmem>>, vector<16x128xf32>,
    %c0_16 = arith.constant 0 : index
    %c256 = arith.constant 256 : index
    %16 = vector.load %arg2[%c0_16, %c256] : memref<16x1024xf32, #tpu.memory_space<vmem>>, vector<16x128xf32>
    %c2 = arith.constant 2 : index
    %c0_17 = arith.constant 0 : index
    %c0_18 = arith.constant 0 : index
    %17 = vector.load %arg3[%c2, %c0_17, %c0_18] : memref<8x128x128xf32, #tpu.memory_space<vmem>>, vector<1x128x128xf32>
    %18 = vector.shape_cast %17 : vector<1x128x128xf32> to vector<128x128xf32>
    %cst_19 = arith.constant dense<0.000000e+00> : vector<16x128xf32>
    %19 = tpu.matmul %16, %18, %cst_19 {dimension_numbers = #tpu.dot_dimension_numbers<[1], [0], [0], [1], [0, 0, 1, 1], [], []>} : vector<16x128xf32>, vector<128x128xf32>, vector<16x128xf32> -> vector<16x128xf32>
    %c0_20 = arith.constant 0 : index
    %c256_21 = arith.constant 256 : index
    %20 = vector.load %arg4[%c0_20, %c256_21] : memref<1x1024xf32, #tpu.memory_space<vmem>>, vector<1x128xf32>
    %21 = vector.broadcast %20 : vector<1x128xf32> to vector<16x128xf32>
    %22 = arith.addf %19, %21 : vector<16x128xf32>
    %c0_22 = arith.constant 0 : index
    %c256_23 = arith.constant 256 : index
    %23 = vector.load %arg5[%c0_22, %c256_23] : memref<16x1024xf32, #tpu.memory_space<vmem>>, vector<16x128xf32>
    tpu.vector_store %arg5[%c0_22, %c256_23], %22 {strides = array<i32>} : memref<16x1024xf32, #tpu.memory_space<vmem>>, vector<16x128xf32>,
    %c0_24 = arith.constant 0 : index
    %c384 = arith.constant 384 : index
    %24 = vector.load %arg2[%c0_24, %c384] : memref<16x1024xf32, #tpu.memory_space<vmem>>, vector<16x128xf32>
    %c3 = arith.constant 3 : index
    %c0_25 = arith.constant 0 : index
    %c0_26 = arith.constant 0 : index
    %25 = vector.load %arg3[%c3, %c0_25, %c0_26] : memref<8x128x128xf32, #tpu.memory_space<vmem>>, vector<1x128x128xf32>
    %26 = vector.shape_cast %25 : vector<1x128x128xf32> to vector<128x128xf32>
    %cst_27 = arith.constant dense<0.000000e+00> : vector<16x128xf32>
    %27 = tpu.matmul %24, %26, %cst_27 {dimension_numbers = #tpu.dot_dimension_numbers<[1], [0], [0], [1], [0, 0, 1, 1], [], []>} : vector<16x128xf32>, vector<128x128xf32>, vector<16x128xf32> -> vector<16x128xf32>
    %c0_28 = arith.constant 0 : index
    %c384_29 = arith.constant 384 : index
    %28 = vector.load %arg4[%c0_28, %c384_29] : memref<1x1024xf32, #tpu.memory_space<vmem>>, vector<1x128xf32>
    %29 = vector.broadcast %28 : vector<1x128xf32> to vector<16x128xf32>
    %30 = arith.addf %27, %29 : vector<16x128xf32>
    %c0_30 = arith.constant 0 : index
    %c384_31 = arith.constant 384 : index
    %31 = vector.load %arg5[%c0_30, %c384_31] : memref<16x1024xf32, #tpu.memory_space<vmem>>, vector<16x128xf32>
    tpu.vector_store %arg5[%c0_30, %c384_31], %30 {strides = array<i32>} : memref<16x1024xf32, #tpu.memory_space<vmem>>, vector<16x128xf32>,
    %c0_32 = arith.constant 0 : index
    %c512 = arith.constant 512 : index
    %32 = vector.load %arg2[%c0_32, %c512] : memref<16x1024xf32, #tpu.memory_space<vmem>>, vector<16x128xf32>
    %c4 = arith.constant 4 : index
    %c0_33 = arith.constant 0 : index
    %c0_34 = arith.constant 0 : index
    %33 = vector.load %arg3[%c4, %c0_33, %c0_34] : memref<8x128x128xf32, #tpu.memory_space<vmem>>, vector<1x128x128xf32>
    %34 = vector.shape_cast %33 : vector<1x128x128xf32> to vector<128x128xf32>
    %cst_35 = arith.constant dense<0.000000e+00> : vector<16x128xf32>
    %35 = tpu.matmul %32, %34, %cst_35 {dimension_numbers = #tpu.dot_dimension_numbers<[1], [0], [0], [1], [0, 0, 1, 1], [], []>} : vector<16x128xf32>, vector<128x128xf32>, vector<16x128xf32> -> vector<16x128xf32>
    %c0_36 = arith.constant 0 : index
    %c512_37 = arith.constant 512 : index
    %36 = vector.load %arg4[%c0_36, %c512_37] : memref<1x1024xf32, #tpu.memory_space<vmem>>, vector<1x128xf32>
    %37 = vector.broadcast %36 : vector<1x128xf32> to vector<16x128xf32>
    %38 = arith.addf %35, %37 : vector<16x128xf32>
    %c0_38 = arith.constant 0 : index
    %c512_39 = arith.constant 512 : index
    %39 = vector.load %arg5[%c0_38, %c512_39] : memref<16x1024xf32, #tpu.memory_space<vmem>>, vector<16x128xf32>
    tpu.vector_store %arg5[%c0_38, %c512_39], %38 {strides = array<i32>} : memref<16x1024xf32, #tpu.memory_space<vmem>>, vector<16x128xf32>,
    %c0_40 = arith.constant 0 : index
    %c640 = arith.constant 640 : index
    %40 = vector.load %arg2[%c0_40, %c640] : memref<16x1024xf32, #tpu.memory_space<vmem>>, vector<16x128xf32>
    %c5 = arith.constant 5 : index
    %c0_41 = arith.constant 0 : index
    %c0_42 = arith.constant 0 : index
    %41 = vector.load %arg3[%c5, %c0_41, %c0_42] : memref<8x128x128xf32, #tpu.memory_space<vmem>>, vector<1x128x128xf32>
    %42 = vector.shape_cast %41 : vector<1x128x128xf32> to vector<128x128xf32>
    %cst_43 = arith.constant dense<0.000000e+00> : vector<16x128xf32>
    %43 = tpu.matmul %40, %42, %cst_43 {dimension_numbers = #tpu.dot_dimension_numbers<[1], [0], [0], [1], [0, 0, 1, 1], [], []>} : vector<16x128xf32>, vector<128x128xf32>, vector<16x128xf32> -> vector<16x128xf32>
    %c0_44 = arith.constant 0 : index
    %c640_45 = arith.constant 640 : index
    %44 = vector.load %arg4[%c0_44, %c640_45] : memref<1x1024xf32, #tpu.memory_space<vmem>>, vector<1x128xf32>
    %45 = vector.broadcast %44 : vector<1x128xf32> to vector<16x128xf32>
    %46 = arith.addf %43, %45 : vector<16x128xf32>
    %c0_46 = arith.constant 0 : index
    %c640_47 = arith.constant 640 : index
    %47 = vector.load %arg5[%c0_46, %c640_47] : memref<16x1024xf32, #tpu.memory_space<vmem>>, vector<16x128xf32>
    tpu.vector_store %arg5[%c0_46, %c640_47], %46 {strides = array<i32>} : memref<16x1024xf32, #tpu.memory_space<vmem>>, vector<16x128xf32>,
    %c0_48 = arith.constant 0 : index
    %c768 = arith.constant 768 : index
    %48 = vector.load %arg2[%c0_48, %c768] : memref<16x1024xf32, #tpu.memory_space<vmem>>, vector<16x128xf32>
    %c6 = arith.constant 6 : index
    %c0_49 = arith.constant 0 : index
    %c0_50 = arith.constant 0 : index
    %49 = vector.load %arg3[%c6, %c0_49, %c0_50] : memref<8x128x128xf32, #tpu.memory_space<vmem>>, vector<1x128x128xf32>
    %50 = vector.shape_cast %49 : vector<1x128x128xf32> to vector<128x128xf32>
    %cst_51 = arith.constant dense<0.000000e+00> : vector<16x128xf32>
    %51 = tpu.matmul %48, %50, %cst_51 {dimension_numbers = #tpu.dot_dimension_numbers<[1], [0], [0], [1], [0, 0, 1, 1], [], []>} : vector<16x128xf32>, vector<128x128xf32>, vector<16x128xf32> -> vector<16x128xf32>
    %c0_52 = arith.constant 0 : index
    %c768_53 = arith.constant 768 : index
    %52 = vector.load %arg4[%c0_52, %c768_53] : memref<1x1024xf32, #tpu.memory_space<vmem>>, vector<1x128xf32>
    %53 = vector.broadcast %52 : vector<1x128xf32> to vector<16x128xf32>
    %54 = arith.addf %51, %53 : vector<16x128xf32>
    %c0_54 = arith.constant 0 : index
    %c768_55 = arith.constant 768 : index
    %55 = vector.load %arg5[%c0_54, %c768_55] : memref<16x1024xf32, #tpu.memory_space<vmem>>, vector<16x128xf32>
    tpu.vector_store %arg5[%c0_54, %c768_55], %54 {strides = array<i32>} : memref<16x1024xf32, #tpu.memory_space<vmem>>, vector<16x128xf32>,
    %c0_56 = arith.constant 0 : index
    %c896 = arith.constant 896 : index
    %56 = vector.load %arg2[%c0_56, %c896] : memref<16x1024xf32, #tpu.memory_space<vmem>>, vector<16x128xf32>
    %c7 = arith.constant 7 : index
    %c0_57 = arith.constant 0 : index
    %c0_58 = arith.constant 0 : index
    %57 = vector.load %arg3[%c7, %c0_57, %c0_58] : memref<8x128x128xf32, #tpu.memory_space<vmem>>, vector<1x128x128xf32>
    %58 = vector.shape_cast %57 : vector<1x128x128xf32> to vector<128x128xf32>
    %cst_59 = arith.constant dense<0.000000e+00> : vector<16x128xf32>
    %59 = tpu.matmul %56, %58, %cst_59 {dimension_numbers = #tpu.dot_dimension_numbers<[1], [0], [0], [1], [0, 0, 1, 1], [], []>} : vector<16x128xf32>, vector<128x128xf32>, vector<16x128xf32> -> vector<16x128xf32>
    %c0_60 = arith.constant 0 : index
    %c896_61 = arith.constant 896 : index
    %60 = vector.load %arg4[%c0_60, %c896_61] : memref<1x1024xf32, #tpu.memory_space<vmem>>, vector<1x128xf32>
    %61 = vector.broadcast %60 : vector<1x128xf32> to vector<16x128xf32>
    %62 = arith.addf %59, %61 : vector<16x128xf32>
    %c0_62 = arith.constant 0 : index
    %c896_63 = arith.constant 896 : index
    %63 = vector.load %arg5[%c0_62, %c896_63] : memref<16x1024xf32, #tpu.memory_space<vmem>>, vector<16x128xf32>
    tpu.vector_store %arg5[%c0_62, %c896_63], %62 {strides = array<i32>} : memref<16x1024xf32, #tpu.memory_space<vmem>>, vector<16x128xf32>,
    return
  }
  func.func @transform_0(%arg0: i32, %arg1: i32) -> (i32, i32) {
    %c0_i32 = arith.constant 0 : i32
    return %arg1, %arg0 : i32, i32
  }
  func.func @transform_1(%arg0: i32, %arg1: i32) -> (i32, i32, i32) {
    %c0_i32 = arith.constant 0 : i32
    %c0_i32_0 = arith.constant 0 : i32
    %c0_i32_1 = arith.constant 0 : i32
    return %arg0, %c0_i32, %c0_i32_0 : i32, i32, i32
  }
  func.func @transform_2(%arg0: i32, %arg1: i32) -> (i32, i32) {
    %c0_i32 = arith.constant 0 : i32
    %c0_i32_0 = arith.constant 0 : i32
    return %c0_i32, %arg0 : i32, i32
  }
  func.func @transform_3(%arg0: i32, %arg1: i32) -> (i32, i32) {
    %c0_i32 = arith.constant 0 : i32
    return %arg1, %arg0 : i32, i32
  }
}

</mosaic_0001>

<bundles_post_ra>
// kernel: tpu_custom_call.1
= control target key start
LH: loop header
LB: loop body
LE: loop exit
PB: predicated region body
PF: predicated region fallthrough
CT: control target
= control target key end

     0   :  { %8 = vsyncpa [#allocation3], 0  ;;  %s1767_s0 = inlined_call_operand.hbm [shape: f32[16,1024], index: 0, kind: input, shape index: {}]   ;;  %s1768_s1 = inlined_call_operand.hbm [shape: f32[8,128,128], index: 1, kind: input, shape index: {}]   ;;  %s1769_s2 = inlined_call_operand.hbm [shape: f32[1,1024], index: 2, kind: input, shape index: {}]   ;;  %s1770_s3 = inlined_call_operand.hbm [shape: f32[16,1024], index: 3, kind: output, shape index: {}]  }
   0x1   :  { %9 = vsyncpa [#allocation6], 0 }
   0x2   :  { %10 = vsyncpa [#allocation4], 0  ;;  %s1685_s12 = smov [#allocation5]   ;;  %s1591_s16 = scalar_lea.hbm %s1768_s1, 16384 }
   0x3   :  { %s28_s13 = sshll.u32 %s1685_s12, 4  ;;  %p1592_p0 = scmp.ne.s32.totalorder %s1768_s1, %s1591_s16  ;;  %s29_s13 = int_to_ptr.vmem [resolvable:$true] %s28_s13 }
   0x4   :  { %p1595_p1 = scmp.lt.u32.totalorder %s1591_s16, %s1768_s1 }
   0x6   :  { %p1597_p2 = pnand %p1595_p1, %p1592_p0 }
   0x8   :  { %1600 = shalt.err (!%p1597_p2)
}
   0x9   :  { %s1601_s21 = scalar_lea.vmem %s29_s13, 16384  ;;  %p1606_p4 = scmp.lt.s32.totalorder %s29_s13, %s29_s13 }
   0xa   :  { %p1602_p3 = scmp.ne.s32.totalorder %s29_s13, %s1601_s21  ;;  %p1607_p5 = scmp.lt.s32.totalorder %s1601_s21, %s1601_s21 }
   0xc   :  { %p1608_p6 = por %p1607_p5, %p1606_p4 }
   0xe   :  { %p1609_p7 = pnand %p1608_p6, %p1602_p3 }
  0x10   :  { %1612 = shalt.err (!%p1609_p7)
}
  0x11   :  { %s1686_s22 = smov 128   ;;  %s1687_s23 = smov 8  }
  0x12   :  { %34 = dma.hbm_to_vmem [thread:$0]  %s1768_s1, 16384, %s29_s13, [#allocation6], %s1686_s22, %s1686_s22, %s1687_s23  }
  0x13   :  { %s1688_s26 = smov [#allocation2]   ;;  %s1613_s30 = scalar_lea.hbm %s1767_s0, 2048 }
  0x14   :  { %s16_s27 = sshll.u32 %s1688_s26, 4  ;;  %p1614_p8 = scmp.ne.s32.totalorder %s1767_s0, %s1613_s30  ;;  %s17_s27 = int_to_ptr.vmem [resolvable:$true] %s16_s27 }
  0x15   :  { %p1617_p9 = scmp.lt.u32.totalorder %s1613_s30, %s1767_s0 }
  0x17   :  { %p1619_p10 = pnand %p1617_p9, %p1614_p8 }
  0x19   :  { %1622 = shalt.err (!%p1619_p10)
}
  0x1a   :  { %s1623_s8 = scalar_lea.vmem %s17_s27, 2048  ;;  %p1628_p12 = scmp.lt.s32.totalorder %s17_s27, %s17_s27 }
  0x1b   :  { %p1624_p11 = scmp.ne.s32.totalorder %s17_s27, %s1623_s8  ;;  %p1629_p13 = scmp.lt.s32.totalorder %s1623_s8, %s1623_s8 }
  0x1d   :  { %p1630_p0 = por %p1629_p13, %p1628_p12 }
  0x1f   :  { %p1631_p1 = pnand %p1630_p0, %p1624_p11 }
  0x21   :  { %1634 = shalt.err (!%p1631_p1)
}
  0x22   :  { %s1689_s1 = smov 1024   ;;  %s1690_s9 = smov 64  }
  0x23   :  { %22 = dma.hbm_to_vmem [thread:$0]  %s1767_s0, 2048, %s17_s27, [#allocation3], %s1689_s1, %s1689_s1, %s1690_s9  }
  0x24   :  { %s1691_s12 = smov [#allocation7]   ;;  %s1635_s16 = scalar_lea.hbm %s1769_s2, 128 }
  0x25   :  { %s41_s13 = sshll.u32 %s1691_s12, 4  ;;  %p1636_p2 = scmp.ne.s32.totalorder %s1769_s2, %s1635_s16  ;;  %s42_s13 = int_to_ptr.vmem [resolvable:$true] %s41_s13 }
  0x26   :  { %p1639_p3 = scmp.lt.u32.totalorder %s1635_s16, %s1769_s2 }
  0x28   :  { %p1641_p4 = pnand %p1639_p3, %p1636_p2 }
  0x2a   :  { %1644 = shalt.err (!%p1641_p4)
}
  0x2b   :  { %s1645_s21 = scalar_lea.vmem %s42_s13, 128  ;;  %p1650_p6 = scmp.lt.s32.totalorder %s42_s13, %s42_s13 }
  0x2c   :  { %p1646_p5 = scmp.ne.s32.totalorder %s42_s13, %s1645_s21  ;;  %p1651_p7 = scmp.lt.s32.totalorder %s1645_s21, %s1645_s21 }
  0x2e   :  { %p1652_p8 = por %p1651_p7, %p1650_p6 }
  0x30   :  { %p1653_p9 = pnand %p1652_p8, %p1646_p5 }
  0x32   :  { %1656 = shalt.err (!%p1653_p9)
}
  0x33   :  { %44 = dma.hbm_to_vmem [thread:$0]  %s1769_s2, 128, %s42_s13, [#allocation6]  }
  0x34   :  { %1679 = dma.done.wait [#allocation3], 2048  }
  0x35   :  { %1680 = vsyncadd [#allocation3], 4294965248 }
  0x36   :  { %1681 = dma.done.wait [#allocation6], 16512  }
  0x37   :  { %1682 = vsyncadd [#allocation6], 4294950784  ;;  %v56_v0 = vld [vmem:[#allocation5] sm:$0xff]  ;;  %v57_v1 = vld [vmem:[#allocation5 + $0x8] sm:$0xff]  ;;  %s1692_s2 = smov [#allocation8]  }
  0x38   :  { %v159_v2 = vld [vmem:[#allocation5 + $0x80] sm:$0xff]  ;;  %v1327_v3 = vpack.c.bf16 %v57_v1, %v56_v0  ;;  %v160_v4 = vld [vmem:[#allocation5 + $0x88] sm:$0xff]  ;;  %v58_v5 = vld [vmem:[#allocation5 + $0x10] sm:$0xff]  ;;  %s882_s23 = sshll.u32 %s1692_s2, 4  ;;  %s883_s23 = int_to_ptr.vmem [resolvable:$true] %s882_s23 }
  0x39   :  { %v59_v6 = vld [vmem:[#allocation5 + $0x18] sm:$0xff]  ;;  %v1359_v7 = vpack.c.bf16 %v160_v4, %v159_v2  ;;  %v161_v9 = vld [vmem:[#allocation5 + $0x90] sm:$0xff]  ;;  %v60_v11 = vld [vmem:[#allocation5 + $0x20] sm:$0xff]  ;;  %s1657_s24 = scalar_lea.vmem %s883_s23, 2048  ;;  %p1662_p11 = scmp.lt.s32.totalorder %s883_s23, %s883_s23 }
  0x3a   :  { %v1331_v8 = vpack.c.bf16 %v59_v6, %v58_v5  ;;  %v162_v10 = vld [vmem:[#allocation5 + $0x98] sm:$0xff]  ;;  %1328 = vmatprep.subr.bf16.mxu0 %v1327_v3  ;;  %v61_v13 = vld [vmem:[#allocation5 + $0x28] sm:$0xff]  ;;  %v163_v14 = vld [vmem:[#allocation5 + $0xa0] sm:$0xff]  ;;  %p1658_p10 = scmp.ne.s32.totalorder %s883_s23, %s1657_s24  ;;  %p1663_p12 = scmp.lt.s32.totalorder %s1657_s24, %s1657_s24 }
  0x3b   :  { %v1363_v12 = vpack.c.bf16 %v162_v10, %v161_v9  ;;  %v164_v15 = vld [vmem:[#allocation5 + $0xa8] sm:$0xff]  ;;  %1360 = vmatprep.subr.bf16.mxu1 %v1359_v7  ;;  %1330 = vmatpush3.bf16.msra.mxu0 %v1327_v3  ;;  %v1335_v16 = vpack.c.bf16 %v61_v13, %v60_v11  ;;  %v62_v18 = vld [vmem:[#allocation5 + $0x30] sm:$0xff]  ;;  %v63_v19 = vld [vmem:[#allocation5 + $0x38] sm:$0xff] }
  0x3c   :  { %1362 = vmatpush3.bf16.msra.mxu1 %v1359_v7  ;;  %1332 = vmatprep.subr.bf16.mxu0 %v1331_v8  ;;  %v1367_v17 = vpack.c.bf16 %v164_v15, %v163_v14  ;;  %v165_v20 = vld [vmem:[#allocation5 + $0xb0] sm:$0xff]  ;;  %v166_v21 = vld [vmem:[#allocation5 + $0xb8] sm:$0xff]  ;;  %v1339_v22 = vpack.c.bf16 %v63_v19, %v62_v18  ;;  %v64_v24 = vld [vmem:[#allocation5 + $0x40] sm:$0xff]  ;;  %p1664_p13 = por %p1663_p12, %p1662_p11 }
  0x3d   :  { %1364 = vmatprep.subr.bf16.mxu1 %v1363_v12  ;;  %v1371_v23 = vpack.c.bf16 %v166_v21, %v165_v20  ;;  %v65_v25 = vld [vmem:[#allocation5 + $0x48] sm:$0xff]  ;;  %v54_v26 = vld [vmem:[#allocation2] sm:$0xff]  ;;  %v66_v32 = vld [vmem:[#allocation5 + $0x50] sm:$0xff] }
  0x3e   :  { %v167_v27 = vld [vmem:[#allocation5 + $0xc0] sm:$0xff]  ;;  %v168_v28 = vld [vmem:[#allocation5 + $0xc8] sm:$0xff]  ;;  %1079 = vmatprep.mubr.f32.mxu0 %v54_v26  ;;  %v1343_v30 = vpack.c.bf16 %v65_v25, %v64_v24  ;;  %v67_v33 = vld [vmem:[#allocation5 + $0x58] sm:$0xff]  ;;  %p1665_p0 = pnand %p1664_p13, %p1658_p10 }
  0x3f   :  { %1334 = vmatpush3.bf16.msra.mxu0 %v1331_v8  ;;  %v156_v29 = vld [vmem:[#allocation2 + $0x8] sm:$0xff]  ;;  %v1375_v31 = vpack.c.bf16 %v168_v28, %v167_v27  ;;  %v169_v34 = vld [vmem:[#allocation5 + $0xd0] sm:$0xff]  ;;  %v170_v35 = vld [vmem:[#allocation5 + $0xd8] sm:$0xff]  ;;  %v1347_v36 = vpack.c.bf16 %v67_v33, %v66_v32 }
  0x40   :  { %1366 = vmatpush3.bf16.msra.mxu1 %v1363_v12  ;;  %1336 = vmatprep.subr.bf16.mxu0 %v1335_v16  ;;  %v1379_v37 = vpack.c.bf16 %v170_v35, %v169_v34  ;;  %v68_v38 = vld [vmem:[#allocation5 + $0x60] sm:$0xff]  ;;  %v69_v39 = vld [vmem:[#allocation5 + $0x68] sm:$0xff]  ;;  %v70_v44 = vld [vmem:[#allocation5 + $0x70] sm:$0xff] }
  0x41   :  { %1368 = vmatprep.subr.bf16.mxu1 %v1367_v17  ;;  %1114 = vmatprep.mubr.f32.mxu1 %v156_v29  ;;  %v171_v40 = vld [vmem:[#allocation5 + $0xe0] sm:$0xff]  ;;  %v172_v41 = vld [vmem:[#allocation5 + $0xe8] sm:$0xff]  ;;  %v1351_v42 = vpack.c.bf16 %v69_v39, %v68_v38  ;;  %v71_v45 = vld [vmem:[#allocation5 + $0x78] sm:$0xff] }
  0x42   :  { %v1383_v43 = vpack.c.bf16 %v172_v41, %v171_v40  ;;  %v173_v46 = vld [vmem:[#allocation5 + $0xf0] sm:$0xff]  ;;  %v174_v47 = vld [vmem:[#allocation5 + $0xf8] sm:$0xff]  ;;  %v1355_v48 = vpack.c.bf16 %v71_v45, %v70_v44  ;;  %v262_v50 = vld [vmem:[#allocation5 + $0x100] sm:$0xff] }
  0x43   :  { %1338 = vmatpush3.bf16.msra.mxu0 %v1335_v16  ;;  %v1387_v49 = vpack.c.bf16 %v174_v47, %v173_v46  ;;  %v263_v51 = vld [vmem:[#allocation5 + $0x108] sm:$0xff]  ;;  %v365_v52 = vld [vmem:[#allocation5 + $0x180] sm:$0xff]  ;;  %v264_v56 = vld [vmem:[#allocation5 + $0x110] sm:$0xff] }
  0x44   :  { %1370 = vmatpush3.bf16.msra.mxu1 %v1367_v17  ;;  %1340 = vmatprep.subr.bf16.mxu0 %v1339_v22  ;;  %v366_v53 = vld [vmem:[#allocation5 + $0x188] sm:$0xff]  ;;  %v1391_v54 = vpack.c.bf16 %v263_v51, %v262_v50  ;;  %v265_v57 = vld [vmem:[#allocation5 + $0x118] sm:$0xff]  ;;  %v367_v58 = vld [vmem:[#allocation5 + $0x190] sm:$0xff] }
  0x45   :  { %1372 = vmatprep.subr.bf16.mxu1 %v1371_v23  ;;  %v1423_v55 = vpack.c.bf16 %v366_v53, %v365_v52  ;;  %v368_v59 = vld [vmem:[#allocation5 + $0x198] sm:$0xff]  ;;  %v55_v60 = vld [vmem:[#allocation2 + $0x40] sm:$0xff]  ;;  %v157_v61 = vld [vmem:[#allocation2 + $0x48] sm:$0xff]  ;;  %v1395_v62 = vpack.c.bf16 %v265_v57, %v264_v56 }
  0x46   :  { %v1427_v63 = vpack.c.bf16 %v368_v59, %v367_v58  ;;  %v266_v0 = vld [vmem:[#allocation5 + $0x120] sm:$0xff]  ;;  %v267_v1 = vld [vmem:[#allocation5 + $0x128] sm:$0xff]  ;;  %v259_v4 = vld [vmem:[#allocation2 + $0x10] sm:$0xff] }
  0x47   :  { %1342 = vmatpush3.bf16.msra.mxu0 %v1339_v22  ;;  %v369_v2 = vld [vmem:[#allocation5 + $0x1a0] sm:$0xff]  ;;  %v370_v3 = vld [vmem:[#allocation5 + $0x1a8] sm:$0xff]  ;;  %v362_v5 = vld [vmem:[#allocation2 + $0x18] sm:$0xff]  ;;  %v1399_v6 = vpack.c.bf16 %v267_v1, %v266_v0 }
  0x48   :  { %1374 = vmatpush3.bf16.msra.mxu1 %v1371_v23  ;;  %1344 = vmatprep.subr.bf16.mxu0 %v1343_v30  ;;  %v1431_v7 = vpack.c.bf16 %v370_v3, %v369_v2  ;;  %v268_v8 = vld [vmem:[#allocation5 + $0x130] sm:$0xff]  ;;  %v269_v9 = vld [vmem:[#allocation5 + $0x138] sm:$0xff]  ;;  %v270_v14 = vld [vmem:[#allocation5 + $0x140] sm:$0xff] }
  0x49   :  { %1376 = vmatprep.subr.bf16.mxu1 %v1375_v31  ;;  %v371_v10 = vld [vmem:[#allocation5 + $0x1b0] sm:$0xff]  ;;  %v372_v11 = vld [vmem:[#allocation5 + $0x1b8] sm:$0xff]  ;;  %v1403_v12 = vpack.c.bf16 %v269_v9, %v268_v8  ;;  %v271_v15 = vld [vmem:[#allocation5 + $0x148] sm:$0xff] }
  0x4a   :  { %v1435_v13 = vpack.c.bf16 %v372_v11, %v371_v10  ;;  %v373_v16 = vld [vmem:[#allocation5 + $0x1c0] sm:$0xff]  ;;  %v374_v17 = vld [vmem:[#allocation5 + $0x1c8] sm:$0xff]  ;;  %v1407_v18 = vpack.c.bf16 %v271_v15, %v270_v14  ;;  %v272_v20 = vld [vmem:[#allocation5 + $0x150] sm:$0xff] }
  0x4b   :  { %1346 = vmatpush3.bf16.msra.mxu0 %v1343_v30  ;;  %v1439_v19 = vpack.c.bf16 %v374_v17, %v373_v16  ;;  %v273_v21 = vld [vmem:[#allocation5 + $0x158] sm:$0xff]  ;;  %v375_v22 = vld [vmem:[#allocation5 + $0x1d0] sm:$0xff]  ;;  %v274_v26 = vld [vmem:[#allocation5 + $0x160] sm:$0xff] }
  0x4c   :  { %1378 = vmatpush3.bf16.msra.mxu1 %v1375_v31  ;;  %1348 = vmatprep.subr.bf16.mxu0 %v1347_v36  ;;  %v376_v23 = vld [vmem:[#allocation5 + $0x1d8] sm:$0xff]  ;;  %v1411_v24 = vpack.c.bf16 %v273_v21, %v272_v20  ;;  %v275_v27 = vld [vmem:[#allocation5 + $0x168] sm:$0xff]  ;;  %v377_v28 = vld [vmem:[#allocation5 + $0x1e0] sm:$0xff] }
  0x4d   :  { %1380 = vmatprep.subr.bf16.mxu1 %v1379_v37  ;;  %v1443_v25 = vpack.c.bf16 %v376_v23, %v375_v22  ;;  %v378_v29 = vld [vmem:[#allocation5 + $0x1e8] sm:$0xff]  ;;  %v1415_v30 = vpack.c.bf16 %v275_v27, %v274_v26  ;;  %v276_v32 = vld [vmem:[#allocation5 + $0x170] sm:$0xff]  ;;  %v277_v33 = vld [vmem:[#allocation5 + $0x178] sm:$0xff] }
  0x4e   :  { %v1447_v31 = vpack.c.bf16 %v378_v29, %v377_v28  ;;  %v379_v34 = vld [vmem:[#allocation5 + $0x1f0] sm:$0xff]  ;;  %v380_v35 = vld [vmem:[#allocation5 + $0x1f8] sm:$0xff]  ;;  %v468_v38 = vld [vmem:[#allocation5 + $0x200] sm:$0xff] }
  0x4f   :  { %1350 = vmatpush3.bf16.msra.mxu0 %v1347_v36  ;;  %v1419_v36 = vpack.c.bf16 %v277_v33, %v276_v32  ;;  %v469_v39 = vld [vmem:[#allocation5 + $0x208] sm:$0xff]  ;;  %v571_v40 = vld [vmem:[#allocation5 + $0x280] sm:$0xff]  ;;  %v470_v44 = vld [vmem:[#allocation5 + $0x210] sm:$0xff] }
  0x50   :  { %1382 = vmatpush3.bf16.msra.mxu1 %v1379_v37  ;;  %1352 = vmatprep.subr.bf16.mxu0 %v1351_v42  ;;  %v1451_v37 = vpack.c.bf16 %v380_v35, %v379_v34  ;;  %v572_v41 = vld [vmem:[#allocation5 + $0x288] sm:$0xff]  ;;  %v471_v45 = vld [vmem:[#allocation5 + $0x218] sm:$0xff]  ;;  %v573_v46 = vld [vmem:[#allocation5 + $0x290] sm:$0xff] }
  0x51   :  { %1384 = vmatprep.subr.bf16.mxu1 %v1383_v43  ;;  %v574_v47 = vld [vmem:[#allocation5 + $0x298] sm:$0xff]  ;;  %v1459_v50 = vpack.c.bf16 %v471_v45, %v470_v44  ;;  %v472_v52 = vld [vmem:[#allocation5 + $0x220] sm:$0xff]  ;;  %v473_v53 = vld [vmem:[#allocation5 + $0x228] sm:$0xff] }
  0x52   :  { %v1491_v51 = vpack.c.bf16 %v574_v47, %v573_v46  ;;  %v465_v56 = vld [vmem:[#allocation2 + $0x20] sm:$0xff]  ;;  %v568_v57 = vld [vmem:[#allocation2 + $0x28] sm:$0xff]  ;;  %v1463_v58 = vpack.c.bf16 %v473_v53, %v472_v52  ;;  %v478_v8 = vld [vmem:[#allocation5 + $0x250] sm:$0xff] }
  0x53   :  { %1354 = vmatpush3.bf16.msra.mxu0 %v1351_v42  ;;  %v1455_v42 = vpack.c.bf16 %v469_v39, %v468_v38  ;;  %v476_v2 = vld [vmem:[#allocation5 + $0x240] sm:$0xff]  ;;  %v477_v3 = vld [vmem:[#allocation5 + $0x248] sm:$0xff]  ;;  %v479_v9 = vld [vmem:[#allocation5 + $0x258] sm:$0xff] }
  0x54   :  { %1386 = vmatpush3.bf16.msra.mxu1 %v1383_v43  ;;  %1356 = vmatprep.subr.bf16.mxu0 %v1355_v48  ;;  %v1487_v43 = vpack.c.bf16 %v572_v41, %v571_v40  ;;  %v581_v10 = vld [vmem:[#allocation5 + $0x2d0] sm:$0xff]  ;;  %v582_v11 = vld [vmem:[#allocation5 + $0x2d8] sm:$0xff]  ;;  %v480_v14 = vld [vmem:[#allocation5 + $0x260] sm:$0xff] }
  0x55   :  { %1388 = vmatprep.subr.bf16.mxu1 %v1387_v49  ;;  %v481_v15 = vld [vmem:[#allocation5 + $0x268] sm:$0xff]  ;;  %v583_v16 = vld [vmem:[#allocation5 + $0x2e0] sm:$0xff]  ;;  %v482_v20 = vld [vmem:[#allocation5 + $0x270] sm:$0xff] }
  0x56   :  { %v584_v17 = vld [vmem:[#allocation5 + $0x2e8] sm:$0xff]  ;;  %v483_v21 = vld [vmem:[#allocation5 + $0x278] sm:$0xff]  ;;  %v585_v22 = vld [vmem:[#allocation5 + $0x2f0] sm:$0xff] }
  0x57   :  { %1358 = vmatpush3.bf16.msra.mxu0 %v1355_v48  ;;  %v260_v48 = vld [vmem:[#allocation2 + $0x50] sm:$0xff]  ;;  %v586_v23 = vld [vmem:[#allocation5 + $0x2f8] sm:$0xff]  ;;  %v674_v26 = vld [vmem:[#allocation5 + $0x300] sm:$0xff] }
  0x58   :  { %1390 = vmatpush3.bf16.msra.mxu1 %v1387_v49  ;;  %1392 = vmatprep.subr.bf16.mxu0 %v1391_v54  ;;  %v363_v49 = vld [vmem:[#allocation2 + $0x58] sm:$0xff]  ;;  %v675_v27 = vld [vmem:[#allocation5 + $0x308] sm:$0xff]  ;;  %v777_v28 = vld [vmem:[#allocation5 + $0x380] sm:$0xff] }
  0x59   :  { %1424 = vmatprep.subr.bf16.mxu1 %v1423_v55  ;;  %v778_v29 = vld [vmem:[#allocation5 + $0x388] sm:$0xff]  ;;  %v676_v32 = vld [vmem:[#allocation5 + $0x310] sm:$0xff]  ;;  %v677_v33 = vld [vmem:[#allocation5 + $0x318] sm:$0xff] }
  0x5a   :  { %1080 = vmatmul.mubr.f32.vlgmr.msra.gmra.mrb[0].mxu0 %v55_v60  ;;  %v474_v60 = vld [vmem:[#allocation5 + $0x230] sm:$0xff]  ;;  %v780_v35 = vld [vmem:[#allocation5 + $0x398] sm:$0xff]  ;;  %v1523_v38 = vpack.c.bf16 %v677_v33, %v676_v32  ;;  %v678_v40 = vld [vmem:[#allocation5 + $0x320] sm:$0xff] }
  0x5b   :  { %1115 = vmatmul.mubr.f32.vlgmr.msra.gmra.mrb[0].mxu1 %v157_v61  ;;  %1394 = vmatpush3.bf16.msra.mxu0 %v1391_v54  ;;  %v575_v54 = vld [vmem:[#allocation5 + $0x2a0] sm:$0xff]  ;;  %v475_v61 = vld [vmem:[#allocation5 + $0x238] sm:$0xff]  ;;  %v779_v34 = vld [vmem:[#allocation5 + $0x390] sm:$0xff] }
  0x5c   :  { %1426 = vmatpush3.bf16.msra.mxu1 %v1423_v55  ;;  %1396 = vmatprep.subr.bf16.mxu0 %v1395_v62  ;;  %v576_v55 = vld [vmem:[#allocation5 + $0x2a8] sm:$0xff]  ;;  %v1467_v0 = vpack.c.bf16 %v475_v61, %v474_v60  ;;  %v1555_v39 = vpack.c.bf16 %v780_v35, %v779_v34  ;;  %v671_v44 = vld [vmem:[#allocation2 + $0x30] sm:$0xff]  ;;  %v774_v45 = vld [vmem:[#allocation2 + $0x38] sm:$0xff] }
  0x5d   :  { %1428 = vmatprep.subr.bf16.mxu1 %v1427_v63  ;;  %1149 = vmatprep.mubr.f32.mxu0 %v259_v4  ;;  %v1495_v59 = vpack.c.bf16 %v576_v55, %v575_v54  ;;  %v579_v4 = vld [vmem:[#allocation5 + $0x2c0] sm:$0xff]  ;;  %v679_v41 = vld [vmem:[#allocation5 + $0x328] sm:$0xff]  ;;  %v684_v60 = vld [vmem:[#allocation5 + $0x350] sm:$0xff] }
  0x5e   :  { %1184 = vmatprep.mubr.f32.mxu1 %v362_v5  ;;  %v580_v5 = vld [vmem:[#allocation5 + $0x2c8] sm:$0xff]  ;;  %v1527_v46 = vpack.c.bf16 %v679_v41, %v678_v40  ;;  %v682_v54 = vld [vmem:[#allocation5 + $0x340] sm:$0xff]  ;;  %v685_v61 = vld [vmem:[#allocation5 + $0x358] sm:$0xff] }
  0x5f   :  { %1398 = vmatpush3.bf16.msra.mxu0 %v1395_v62  ;;  %v577_v62 = vld [vmem:[#allocation5 + $0x2b0] sm:$0xff]  ;;  %v683_v55 = vld [vmem:[#allocation5 + $0x348] sm:$0xff] }
  0x60   :  { %1430 = vmatpush3.bf16.msra.mxu1 %v1427_v63  ;;  %1400 = vmatprep.subr.bf16.mxu0 %v1399_v6  ;;  %v578_v63 = vld [vmem:[#allocation5 + $0x2b8] sm:$0xff] }
  0x61   :  { %1432 = vmatprep.subr.bf16.mxu1 %v1431_v7  ;;  %v1499_v1 = vpack.c.bf16 %v578_v63, %v577_v62  ;;  %v787_v62 = vld [vmem:[#allocation5 + $0x3d0] sm:$0xff]  ;;  %v788_v63 = vld [vmem:[#allocation5 + $0x3d8] sm:$0xff] }
  0x63   :  { %1402 = vmatpush3.bf16.msra.mxu0 %v1399_v6  ;;  %v1471_v6 = vpack.c.bf16 %v477_v3, %v476_v2  ;;  %v686_v2 = vld [vmem:[#allocation5 + $0x360] sm:$0xff]  ;;  %v687_v3 = vld [vmem:[#allocation5 + $0x368] sm:$0xff] }
  0x64   :  { %1434 = vmatpush3.bf16.msra.mxu1 %v1431_v7  ;;  %1404 = vmatprep.subr.bf16.mxu0 %v1403_v12  ;;  %v1503_v7 = vpack.c.bf16 %v580_v5, %v579_v4  ;;  %v789_v4 = vld [vmem:[#allocation5 + $0x3e0] sm:$0xff]  ;;  %v790_v5 = vld [vmem:[#allocation5 + $0x3e8] sm:$0xff] }
  0x65   :  { %1436 = vmatprep.subr.bf16.mxu1 %v1435_v13 }
  0x67   :  { %1406 = vmatpush3.bf16.msra.mxu0 %v1403_v12  ;;  %v1475_v12 = vpack.c.bf16 %v479_v9, %v478_v8  ;;  %v688_v8 = vld [vmem:[#allocation5 + $0x370] sm:$0xff]  ;;  %v689_v9 = vld [vmem:[#allocation5 + $0x378] sm:$0xff] }
  0x68   :  { %1438 = vmatpush3.bf16.msra.mxu1 %v1435_v13  ;;  %1408 = vmatprep.subr.bf16.mxu0 %v1407_v18  ;;  %v1507_v13 = vpack.c.bf16 %v582_v11, %v581_v10  ;;  %v791_v10 = vld [vmem:[#allocation5 + $0x3f0] sm:$0xff]  ;;  %v792_v11 = vld [vmem:[#allocation5 + $0x3f8] sm:$0xff] }
  0x69   :  { %1440 = vmatprep.subr.bf16.mxu1 %v1439_v19 }
  0x6b   :  { %1410 = vmatpush3.bf16.msra.mxu0 %v1407_v18  ;;  %v1479_v18 = vpack.c.bf16 %v481_v15, %v480_v14  ;;  %v672_v14 = vld [vmem:[#allocation2 + $0x70] sm:$0xff]  ;;  %v775_v15 = vld [vmem:[#allocation2 + $0x78] sm:$0xff] }
  0x6c   :  { %1442 = vmatpush3.bf16.msra.mxu1 %v1439_v19  ;;  %1412 = vmatprep.subr.bf16.mxu0 %v1411_v24  ;;  %v1511_v19 = vpack.c.bf16 %v584_v17, %v583_v16  ;;  %v895_v16 = vld [vmem:[#allocation7] ss:$0 sm:$0xff]  ;;  %v896_v17 = vld [vmem:[#allocation7 + $0x1] ss:$0 sm:$0xff] }
  0x6d   :  { %1444 = vmatprep.subr.bf16.mxu1 %v1443_v25 }
  0x6f   :  { %1414 = vmatpush3.bf16.msra.mxu0 %v1411_v24  ;;  %v1483_v24 = vpack.c.bf16 %v483_v21, %v482_v20 }
  0x70   :  { %1446 = vmatpush3.bf16.msra.mxu1 %v1443_v25  ;;  %1416 = vmatprep.subr.bf16.mxu0 %v1415_v30  ;;  %v1515_v25 = vpack.c.bf16 %v586_v23, %v585_v22 }
  0x71   :  { %1448 = vmatprep.subr.bf16.mxu1 %v1447_v31 }
  0x73   :  { %1418 = vmatpush3.bf16.msra.mxu0 %v1415_v30  ;;  %v1519_v30 = vpack.c.bf16 %v675_v27, %v674_v26  ;;  %v897_v26 = vld [vmem:[#allocation7 + $0x2] ss:$0 sm:$0xff]  ;;  %v898_v27 = vld [vmem:[#allocation7 + $0x3] ss:$0 sm:$0xff] }
  0x74   :  { %1450 = vmatpush3.bf16.msra.mxu1 %v1447_v31  ;;  %1420 = vmatprep.subr.bf16.mxu0 %v1419_v36  ;;  %v1551_v31 = vpack.c.bf16 %v778_v29, %v777_v28 }
  0x75   :  { %1452 = vmatprep.subr.bf16.mxu1 %v1451_v37 }
  0x77   :  { %1422 = vmatpush3.bf16.msra.mxu0 %v1419_v36  ;;  %v466_v36 = vld [vmem:[#allocation2 + $0x60] sm:$0xff] }
  0x78   :  { %1454 = vmatpush3.bf16.msra.mxu1 %v1451_v37  ;;  %1456 = vmatprep.subr.bf16.mxu0 %v1455_v42  ;;  %v569_v37 = vld [vmem:[#allocation2 + $0x68] sm:$0xff] }
  0x79   :  { %1488 = vmatprep.subr.bf16.mxu1 %v1487_v43 }
  0x7a   :  { %1150 = vmatmul.mubr.f32.vlgmr.msra.gmra.mrb[2].mxu0 %v260_v48  ;;  %v680_v48 = vld [vmem:[#allocation5 + $0x330] sm:$0xff] }
  0x7b   :  { %1185 = vmatmul.mubr.f32.vlgmr.msra.gmra.mrb[2].mxu1 %v363_v49  ;;  %1458 = vmatpush3.bf16.msra.mxu0 %v1455_v42  ;;  %v781_v42 = vld [vmem:[#allocation5 + $0x3a0] sm:$0xff]  ;;  %v681_v49 = vld [vmem:[#allocation5 + $0x338] sm:$0xff] }
  0x7c   :  { %1490 = vmatpush3.bf16.msra.mxu1 %v1487_v43  ;;  %1460 = vmatprep.subr.bf16.mxu0 %v1459_v50  ;;  %v782_v43 = vld [vmem:[#allocation5 + $0x3a8] sm:$0xff]  ;;  %v1531_v52 = vpack.c.bf16 %v681_v49, %v680_v48 }
  0x7d   :  { %1492 = vmatprep.subr.bf16.mxu1 %v1491_v51  ;;  %1219 = vmatprep.mubr.f32.mxu0 %v465_v56  ;;  %v1559_v47 = vpack.c.bf16 %v782_v43, %v781_v42  ;;  %v785_v56 = vld [vmem:[#allocation5 + $0x3c0] sm:$0xff] }
  0x7e   :  { %1254 = vmatprep.mubr.f32.mxu1 %v568_v57  ;;  %v786_v57 = vld [vmem:[#allocation5 + $0x3c8] sm:$0xff] }
  0x7f   :  { %1462 = vmatpush3.bf16.msra.mxu0 %v1459_v50  ;;  %v783_v50 = vld [vmem:[#allocation5 + $0x3b0] sm:$0xff] }
  0x80   :  { %1494 = vmatpush3.bf16.msra.mxu1 %v1491_v51  ;;  %1464 = vmatprep.subr.bf16.mxu0 %v1463_v58  ;;  %v784_v51 = vld [vmem:[#allocation5 + $0x3b8] sm:$0xff] }
  0x81   :  { %1496 = vmatprep.subr.bf16.mxu1 %v1495_v59  ;;  %v1563_v53 = vpack.c.bf16 %v784_v51, %v783_v50 }
  0x83   :  { %1466 = vmatpush3.bf16.msra.mxu0 %v1463_v58  ;;  %v1535_v58 = vpack.c.bf16 %v683_v55, %v682_v54 }
  0x84   :  { %1498 = vmatpush3.bf16.msra.mxu1 %v1495_v59  ;;  %1468 = vmatprep.subr.bf16.mxu0 %v1467_v0  ;;  %v1567_v59 = vpack.c.bf16 %v786_v57, %v785_v56 }
  0x85   :  { %1500 = vmatprep.subr.bf16.mxu1 %v1499_v1 }
  0x87   :  { %1470 = vmatpush3.bf16.msra.mxu0 %v1467_v0  ;;  %v1539_v0 = vpack.c.bf16 %v685_v61, %v684_v60 }
  0x88   :  { %1502 = vmatpush3.bf16.msra.mxu1 %v1499_v1  ;;  %1472 = vmatprep.subr.bf16.mxu0 %v1471_v6  ;;  %v1571_v1 = vpack.c.bf16 %v788_v63, %v787_v62 }
  0x89   :  { %1504 = vmatprep.subr.bf16.mxu1 %v1503_v7 }
  0x8b   :  { %1474 = vmatpush3.bf16.msra.mxu0 %v1471_v6  ;;  %v1543_v6 = vpack.c.bf16 %v687_v3, %v686_v2 }
  0x8c   :  { %1506 = vmatpush3.bf16.msra.mxu1 %v1503_v7  ;;  %1476 = vmatprep.subr.bf16.mxu0 %v1475_v12  ;;  %v1575_v7 = vpack.c.bf16 %v790_v5, %v789_v4 }
  0x8d   :  { %1508 = vmatprep.subr.bf16.mxu1 %v1507_v13 }
  0x8f   :  { %1478 = vmatpush3.bf16.msra.mxu0 %v1475_v12  ;;  %v1547_v12 = vpack.c.bf16 %v689_v9, %v688_v8 }
  0x90   :  { %1510 = vmatpush3.bf16.msra.mxu1 %v1507_v13  ;;  %1480 = vmatprep.subr.bf16.mxu0 %v1479_v18  ;;  %v1579_v13 = vpack.c.bf16 %v792_v11, %v791_v10 }
  0x91   :  { %1512 = vmatprep.subr.bf16.mxu1 %v1511_v19 }
  0x93   :  { %1482 = vmatpush3.bf16.msra.mxu0 %v1479_v18 }
  0x94   :  { %1514 = vmatpush3.bf16.msra.mxu1 %v1511_v19  ;;  %1484 = vmatprep.subr.bf16.mxu0 %v1483_v24 }
  0x95   :  { %1516 = vmatprep.subr.bf16.mxu1 %v1515_v25 }
  0x97   :  { %1486 = vmatpush3.bf16.msra.mxu0 %v1483_v24 }
  0x98   :  { %1518 = vmatpush3.bf16.msra.mxu1 %v1515_v25  ;;  %1520 = vmatprep.subr.bf16.mxu0 %v1519_v30 }
  0x99   :  { %1552 = vmatprep.subr.bf16.mxu1 %v1551_v31 }
  0x9a   :  { %1220 = vmatmul.mubr.f32.vlgmr.msra.gmra.mrb[4].mxu0 %v466_v36  ;;  %v899_v36 = vld [vmem:[#allocation7 + $0x4] ss:$0 sm:$0xff] }
  0x9b   :  { %1255 = vmatmul.mubr.f32.vlgmr.msra.gmra.mrb[4].mxu1 %v569_v37  ;;  %1522 = vmatpush3.bf16.msra.mxu0 %v1519_v30  ;;  %v900_v37 = vld [vmem:[#allocation7 + $0x5] ss:$0 sm:$0xff] }
  0x9c   :  { %1554 = vmatpush3.bf16.msra.mxu1 %v1551_v31  ;;  %1524 = vmatprep.subr.bf16.mxu0 %v1523_v38 }
  0x9d   :  { %1556 = vmatprep.subr.bf16.mxu1 %v1555_v39  ;;  %1289 = vmatprep.mubr.f32.mxu0 %v671_v44 }
  0x9e   :  { %1324 = vmatprep.mubr.f32.mxu1 %v774_v45 }
  0x9f   :  { %1526 = vmatpush3.bf16.msra.mxu0 %v1523_v38 }
  0xa0   :  { %1558 = vmatpush3.bf16.msra.mxu1 %v1555_v39  ;;  %1528 = vmatprep.subr.bf16.mxu0 %v1527_v46 }
  0xa1   :  { %1560 = vmatprep.subr.bf16.mxu1 %v1559_v47 }
  0xa3   :  { %1530 = vmatpush3.bf16.msra.mxu0 %v1527_v46  ;;  %v901_v46 = vld [vmem:[#allocation7 + $0x6] ss:$0 sm:$0xff] }
  0xa4   :  { %1562 = vmatpush3.bf16.msra.mxu1 %v1559_v47  ;;  %1532 = vmatprep.subr.bf16.mxu0 %v1531_v52  ;;  %v902_v47 = vld [vmem:[#allocation7 + $0x7] ss:$0 sm:$0xff] }
  0xa5   :  { %1564 = vmatprep.subr.bf16.mxu1 %v1563_v53 }
  0xa7   :  { %1534 = vmatpush3.bf16.msra.mxu0 %v1531_v52 }
  0xa8   :  { %1566 = vmatpush3.bf16.msra.mxu1 %v1563_v53  ;;  %1536 = vmatprep.subr.bf16.mxu0 %v1535_v58 }
  0xa9   :  { %1568 = vmatprep.subr.bf16.mxu1 %v1567_v59 }
  0xab   :  { %1538 = vmatpush3.bf16.msra.mxu0 %v1535_v58 }
  0xac   :  { %1570 = vmatpush3.bf16.msra.mxu1 %v1567_v59  ;;  %1540 = vmatprep.subr.bf16.mxu0 %v1539_v0 }
  0xad   :  { %1572 = vmatprep.subr.bf16.mxu1 %v1571_v1 }
  0xaf   :  { %1542 = vmatpush3.bf16.msra.mxu0 %v1539_v0 }
  0xb0   :  { %1574 = vmatpush3.bf16.msra.mxu1 %v1571_v1  ;;  %1544 = vmatprep.subr.bf16.mxu0 %v1543_v6 }
  0xb1   :  { %1576 = vmatprep.subr.bf16.mxu1 %v1575_v7 }
  0xb3   :  { %1546 = vmatpush3.bf16.msra.mxu0 %v1543_v6 }
  0xb4   :  { %1578 = vmatpush3.bf16.msra.mxu1 %v1575_v7  ;;  %1548 = vmatprep.subr.bf16.mxu0 %v1547_v12 }
  0xb5   :  { %1580 = vmatprep.subr.bf16.mxu1 %v1579_v13 }
  0xb7   :  { %1550 = vmatpush3.bf16.msra.mxu0 %v1547_v12 }
  0xb8   :  { %1582 = vmatpush3.bf16.msra.mxu1 %v1579_v13 }
  0xba   :  { %1290 = vmatmul.mubr.f32.vlgmr.msra.gmra.mrb[6].mxu0 %v672_v14 }
  0xbb   :  { %1325 = vmatmul.mubr.f32.vlgmr.msra.gmra.mrb[6].mxu1 %v775_v15 }
 0x12d   :  { %v1081_v18 = vpop.f32.mrb[0].mxu0 }
 0x12e   :  { %v151_v19 = vadd.f32 %v1081_v18, %v895_v16  ;;  %v1116_v20 = vpop.f32.mrb[0].mxu1  ;;  %v145_v21 = vpop.f32.mrb[1].mxu0 }
 0x12f   :  { %v254_v22 = vadd.f32 %v1116_v20, %v896_v17  ;;  %v146_v23 = vadd.f32 %v895_v16, %v145_v21  ;;  %v248_v24 = vpop.f32.mrb[1].mxu1 }
 0x130   :  { %155 = vst [vmem:[#allocation8 + $0x40] sm:$0xff] %v151_v19  ;;  %v249_v25 = vadd.f32 %v896_v17, %v248_v24 }
 0x131   :  { %258 = vst [vmem:[#allocation8 + $0x48] sm:$0xff] %v254_v22  ;;  %154 = vst [vmem:[#allocation8] sm:$0xff] %v146_v23 }
 0x132   :  { %257 = vst [vmem:[#allocation8 + $0x8] sm:$0xff] %v249_v25 }
 0x14d   :  { %v1151_v28 = vpop.f32.mrb[2].mxu0 }
 0x14e   :  { %v357_v29 = vadd.f32 %v1151_v28, %v897_v26  ;;  %v1186_v30 = vpop.f32.mrb[2].mxu1  ;;  %v351_v31 = vpop.f32.mrb[3].mxu0 }
 0x14f   :  { %v460_v32 = vadd.f32 %v1186_v30, %v898_v27  ;;  %v352_v33 = vadd.f32 %v897_v26, %v351_v31  ;;  %v454_v34 = vpop.f32.mrb[3].mxu1 }
 0x150   :  { %361 = vst [vmem:[#allocation8 + $0x50] sm:$0xff] %v357_v29  ;;  %v455_v35 = vadd.f32 %v898_v27, %v454_v34 }
 0x151   :  { %464 = vst [vmem:[#allocation8 + $0x58] sm:$0xff] %v460_v32  ;;  %360 = vst [vmem:[#allocation8 + $0x10] sm:$0xff] %v352_v33 }
 0x152   :  { %463 = vst [vmem:[#allocation8 + $0x18] sm:$0xff] %v455_v35 }
 0x16d   :  { %v1221_v38 = vpop.f32.mrb[4].mxu0 }
 0x16e   :  { %v563_v39 = vadd.f32 %v1221_v38, %v899_v36  ;;  %v1256_v40 = vpop.f32.mrb[4].mxu1  ;;  %v557_v41 = vpop.f32.mrb[5].mxu0 }
 0x16f   :  { %v666_v42 = vadd.f32 %v1256_v40, %v900_v37  ;;  %v558_v43 = vadd.f32 %v899_v36, %v557_v41  ;;  %v660_v44 = vpop.f32.mrb[5].mxu1 }
 0x170   :  { %567 = vst [vmem:[#allocation8 + $0x60] sm:$0xff] %v563_v39  ;;  %v661_v45 = vadd.f32 %v900_v37, %v660_v44 }
 0x171   :  { %670 = vst [vmem:[#allocation8 + $0x68] sm:$0xff] %v666_v42  ;;  %566 = vst [vmem:[#allocation8 + $0x20] sm:$0xff] %v558_v43 }
 0x172   :  { %669 = vst [vmem:[#allocation8 + $0x28] sm:$0xff] %v661_v45 }
 0x18d   :  { %v1291_v48 = vpop.f32.mrb[6].mxu0 }
 0x18e   :  { %v769_v49 = vadd.f32 %v1291_v48, %v901_v46  ;;  %v1326_v50 = vpop.f32.mrb[6].mxu1  ;;  %v763_v51 = vpop.f32.mrb[7].mxu0 }
 0x18f   :  { %v872_v52 = vadd.f32 %v1326_v50, %v902_v47  ;;  %v764_v53 = vadd.f32 %v901_v46, %v763_v51  ;;  %v866_v54 = vpop.f32.mrb[7].mxu1 }
 0x190   :  { %773 = vst [vmem:[#allocation8 + $0x70] sm:$0xff] %v769_v49  ;;  %v867_v55 = vadd.f32 %v902_v47, %v866_v54 }
 0x191   :  { %876 = vst [vmem:[#allocation8 + $0x78] sm:$0xff] %v872_v52  ;;  %772 = vst [vmem:[#allocation8 + $0x30] sm:$0xff] %v764_v53 }
 0x192   :  { %875 = vst [vmem:[#allocation8 + $0x38] sm:$0xff] %v867_v55 }
 0x193   :  { %1668 = shalt.err (!%p1665_p0)
}
 0x194   :  { %s1669_s27 = scalar_lea.hbm %s1770_s3, 2048 }
 0x195   :  { %p1670_p1 = scmp.ne.s32.totalorder %s1770_s3, %s1669_s27  ;;  %p1673_p2 = scmp.lt.u32.totalorder %s1669_s27, %s1770_s3 }
 0x197   :  { %p1675_p3 = pnand %p1673_p2, %p1670_p1 }
 0x199   :  { %1678 = shalt.err (!%p1675_p3)
}
 0x19a   :  { %888 = dma.vmem_to_hbm [thread:$0]  %s883_s23, 2048, %s1770_s3, [#allocation4], %s1689_s1, %s1689_s1, %s1690_s9  }
 0x19b   :  { %1683 = dma.done.wait [#allocation4], 2048  }
 0x19c   :  { %1684 = vsyncadd [#allocation4], 4294965248 }
 0x19d   :  { %892 = vsyncpa [#allocation3], 1 }
 0x19e   :  { %893 = vsyncpa [#allocation6], 1 }
 0x19f   :  { %894 = vsyncpa [#allocation4], 1 }

</bundles_post_ra>
